<compile_context>
chip_gen: v7x
topology: tpu7x:2x2x1
jax: 0.10.0
libtpu: 0.0.40
codegen_flags: <defaults>
</compile_context>

<pallas_src>
import jax
import jax.numpy as jnp
from jax.experimental import pallas as pl
from jax.experimental.pallas import tpu as pltpu


def basic_block_kernel(x_ref, m1_ref, s1_ref, b1_ref, m2_ref, s2_ref, b2_ref,
                       o_ref):
    # x_ref:  (1, H, W*Cin)   bf16, lane-dense image block (also the residual)
    # m*_ref: (3*W*Cin, W*Cout) bf16 banded conv weights (kh stacked along K)
    # s*/b*:  (1, W*Cout)     f32 fused BN scale / bias (tiled over W)
    # o_ref:  (1, H, W*Cout)
    H = x_ref.shape[1]

    row = jax.lax.broadcasted_iota(jnp.int32, (H, 1), 0)
    first_row = row == 0
    last_row = row == H - 1

    def conv3x3(a, m_ref):
        # a: (H, W*Cin) f32.  kh taps via XLU sublane rolls + edge masks; the
        # kw taps and the W dim are fused into the banded weight, so the whole
        # 3x3 conv is a single lane-dense bf16 MXU matmul with f32 accumulate.
        up = jnp.where(first_row, 0.0, pltpu.roll(a, shift=1, axis=0))
        down = jnp.where(last_row, 0.0, pltpu.roll(a, shift=H - 1, axis=0))
        taps = jnp.concatenate([up, a, down], axis=1).astype(jnp.bfloat16)
        return jnp.dot(taps, m_ref[...], preferred_element_type=jnp.float32)

    x = x_ref[0].astype(jnp.float32)                   # (H, W*Cin), f32

    y = conv3x3(x, m1_ref)                             # conv1
    y = jnp.maximum(y * s1_ref[...] + b1_ref[...], 0.0)  # bn1 + relu (f32 VPU)
    y = conv3x3(y, m2_ref)                             # conv2
    y = y * s2_ref[...] + b2_ref[...]                  # bn2
    out = jnp.maximum(y + x, 0.0)                      # residual + relu
    o_ref[...] = out[None].astype(o_ref.dtype)         # unmasked lane-dense vst


def _band_weight(w_hwio, W):
    """HWIO [3,3,Cin,Cout] -> banded matrix [3*W*Cin, W*Cout].

    M[(kh*W + wi)*Cin + ci, wo*Cout + co] = w[kh, wi-wo+1, ci, co] when
    0 <= wi-wo+1 < 3 else 0.  Zero entries implement the W-padding of the conv.
    """
    kh, kw, cin, cout = w_hwio.shape
    wi = jnp.arange(W)[:, None]
    wo = jnp.arange(W)[None, :]
    dw = wi - wo + 1                                    # (W, W)
    valid = (dw >= 0) & (dw < kw)
    m = w_hwio[:, jnp.clip(dw, 0, kw - 1), :, :]        # (3, W_i, W_o, Cin, Cout)
    m = jnp.where(valid[None, :, :, None, None], m, 0.0)
    m = jnp.transpose(m, (0, 1, 3, 2, 4))               # (3, W_i, Cin, W_o, Cout)
    return m.reshape(kh * W * cin, W * cout)


def _fuse_bn(bn, W, C, eps):
    gamma, beta, mean, var = [jnp.asarray(t, jnp.float32) for t in bn]
    scale = gamma / jnp.sqrt(var + eps)
    bias = beta - mean * scale
    # Tile per-channel params over W so they broadcast against (H, W*C).
    return (jnp.tile(scale, W).reshape(1, W * C),
            jnp.tile(bias, W).reshape(1, W * C))


def basic_block(x_nhwc, w1_hwio, bn1, w2_hwio, bn2, eps=1e-5):
    """x_nhwc: [N,H,W,C]; w*_hwio: [3,3,Cin,Cout]; bn* = (gamma, beta, mean, var)."""
    N, H, W, Cin = x_nhwc.shape
    Cout = w1_hwio.shape[-1]
    assert Cin == Cout, "stride=1 / downsample=None requires inplanes == planes"
    WCi, WCo = W * Cin, W * Cout

    # Lane-dense, bf16 inputs (bf16 MXU operands; halves HBM/VMEM bytes).
    xf = x_nhwc.reshape(N, H, WCi).astype(jnp.bfloat16)
    m1 = _band_weight(w1_hwio.astype(jnp.float32), W).astype(jnp.bfloat16)
    m2 = _band_weight(w2_hwio.astype(jnp.float32), W).astype(jnp.bfloat16)
    s1, b1 = _fuse_bn(bn1, W, Cout, eps)
    s2, b2 = _fuse_bn(bn2, W, Cout, eps)

    # Advisory cost estimate (MXU flops actually performed + bytes moved).
    mxu_flops = N * 2 * (2 * H * (3 * WCi) * WCo)
    bytes_accessed = (N * H * WCi * 2                 # x (bf16)
                      + (3 * WCi * WCo + 3 * WCo * WCo) * 2   # banded weights
                      + 4 * WCo * 4                   # fused BN vectors
                      + N * H * WCo * 4)              # output (f32)

    out = pl.pallas_call(
        basic_block_kernel,
        out_shape=jax.ShapeDtypeStruct((N, H, WCo), x_nhwc.dtype),
        grid_spec=pltpu.PrefetchScalarGridSpec(
            num_scalar_prefetch=0,
            grid=(N,),   # per-image VMEM is tiny here; large feature maps would
                         # add an H-tile grid axis (with halo) instead.
            in_specs=[
                pl.BlockSpec((1, H, WCi), lambda n: (n, 0, 0)),
                # Grid-invariant operands (constant index_map -> fetched once;
                # could be single-buffered via pipeline_mode=pl.Buffered(1)).
                pl.BlockSpec((3 * WCi, WCo), lambda n: (0, 0)),
                pl.BlockSpec((1, WCo), lambda n: (0, 0)),
                pl.BlockSpec((1, WCo), lambda n: (0, 0)),
                pl.BlockSpec((3 * WCo, WCo), lambda n: (0, 0)),
                pl.BlockSpec((1, WCo), lambda n: (0, 0)),
                pl.BlockSpec((1, WCo), lambda n: (0, 0)),
            ],
            out_specs=pl.BlockSpec((1, H, WCo), lambda n: (n, 0, 0)),
        ),
        compiler_params=pltpu.CompilerParams(
            dimension_semantics=("parallel",),
            vmem_limit_bytes=32 * 1024 * 1024,   # actual need ~0.6 MiB; headroom
        ),
        cost_estimate=pl.CostEstimate(flops=mxu_flops, transcendentals=0,
                                      bytes_accessed=bytes_accessed),
    )(xf, m1, s1, b1, m2, s2, b2)

    return out.reshape(N, H, W, Cout)


def reference(x_nhwc, w1_hwio, bn1, w2_hwio, bn2, eps=1e-5):
    """Pure-JAX reference of BasicBlock.forward (eval-mode BN).

    Mirrors the kernel's bf16 rounding of the MXU operands (input/weights and
    the conv2 input), with f32 accumulation, so tolerances stay tight.
    """
    r = lambda t: t.astype(jnp.bfloat16).astype(jnp.float32)

    def conv(a, w):
        return jax.lax.conv_general_dilated(
            r(a), r(w), window_strides=(1, 1), padding="SAME",
            dimension_numbers=("NHWC", "HWIO", "NHWC"),
            preferred_element_type=jnp.float32)

    def bn(a, p):
        gamma, beta, mean, var = p
        return (a - mean) / jnp.sqrt(var + eps) * gamma + beta

    xq = r(x_nhwc)                       # kernel ingests x as bf16
    out = jax.nn.relu(bn(conv(xq, w1_hwio), bn1))
    out = bn(conv(out, w2_hwio), bn2)
    return jax.nn.relu(out + xq)


if __name__ == "__main__":
    key = jax.random.PRNGKey(0)
    ks = jax.random.split(key, 12)

    # Small shapes consistent with the module: batch=2, channels=8, spatial=16.
    # (W * C = 128, so the kernel's lane dimension is exactly one lane-tile.)
    N, C, Hs, Ws = 2, 8, 16, 16

    # PyTorch-convention NCHW input, converted to the kernel's NHWC layout.
    x_nchw = jax.random.normal(ks[0], (N, C, Hs, Ws), jnp.float32)
    x = jnp.transpose(x_nchw, (0, 2, 3, 1))  # NCHW -> NHWC

    # conv3x3 weights (no bias): PyTorch OIHW -> HWIO.
    w1_oihw = jax.random.normal(ks[1], (C, C, 3, 3), jnp.float32) * 0.1
    w2_oihw = jax.random.normal(ks[2], (C, C, 3, 3), jnp.float32) * 0.1
    w1 = jnp.transpose(w1_oihw, (2, 3, 1, 0))
    w2 = jnp.transpose(w2_oihw, (2, 3, 1, 0))

    # BatchNorm parameters (gamma, beta, running_mean, running_var).
    # TODO(synk): PyTorch module defaults to training-mode BN (batch stats);
    # kernel implements eval-mode BN with fused running statistics.
    bn1 = (jax.random.uniform(ks[3], (C,), minval=0.5, maxval=1.5),
           jax.random.normal(ks[4], (C,)) * 0.1,
           jax.random.normal(ks[5], (C,)) * 0.1,
           jax.random.uniform(ks[6], (C,), minval=0.5, maxval=1.5))
    bn2 = (jax.random.uniform(ks[7], (C,), minval=0.5, maxval=1.5),
           jax.random.normal(ks[8], (C,)) * 0.1,
           jax.random.normal(ks[9], (C,)) * 0.1,
           jax.random.uniform(ks[10], (C,), minval=0.5, maxval=1.5))

    out = basic_block(x, w1, bn1, w2, bn2)
    jax.block_until_ready(out)

    ref = reference(x, w1, bn1, w2, bn2)
    assert out.shape == (N, Hs, Ws, C), out.shape
    max_err = float(jnp.max(jnp.abs(out - ref)))
    assert jnp.allclose(out, ref, atol=1e-3, rtol=1e-3), max_err

    print("KERNEL_OK")
</pallas_src>

<mosaic_0001>
module attributes {stable_mosaic.version = 11 : i64} {
  func.func @basic_block_kernel(%arg0: i32, %arg1: memref<1x16x128xbf16, #tpu.memory_space<vmem>>, %arg2: memref<384x128xbf16, #tpu.memory_space<vmem>>, %arg3: memref<1x128xf32, #tpu.memory_space<vmem>>, %arg4: memref<1x128xf32, #tpu.memory_space<vmem>>, %arg5: memref<384x128xbf16, #tpu.memory_space<vmem>>, %arg6: memref<1x128xf32, #tpu.memory_space<vmem>>, %arg7: memref<1x128xf32, #tpu.memory_space<vmem>>, %arg8: memref<1x16x128xf32, #tpu.memory_space<vmem>>) attributes {dimension_semantics = [#tpu.dimension_semantics<parallel>], iteration_bounds = array<i64: 2>, scalar_prefetch = 0 : i64, scratch_operands = 0 : i64, tpu.core_type = #tpu.core_type<tc>, window_params = [{transform_indices = @transform_0, window_bounds = array<i64: 1, 16, 128>}, {pipeline_mode = #tpu.pipeline_mode<synchronous>, transform_indices = @transform_1, window_bounds = array<i64: 384, 128>}, {pipeline_mode = #tpu.pipeline_mode<synchronous>, transform_indices = @transform_2, window_bounds = array<i64: 1, 128>}, {pipeline_mode = #tpu.pipeline_mode<synchronous>, transform_indices = @transform_3, window_bounds = array<i64: 1, 128>}, {pipeline_mode = #tpu.pipeline_mode<synchronous>, transform_indices = @transform_4, window_bounds = array<i64: 384, 128>}, {pipeline_mode = #tpu.pipeline_mode<synchronous>, transform_indices = @transform_5, window_bounds = array<i64: 1, 128>}, {pipeline_mode = #tpu.pipeline_mode<synchronous>, transform_indices = @transform_6, window_bounds = array<i64: 1, 128>}, {transform_indices = @transform_7, window_bounds = array<i64: 1, 16, 128>}]} {
    %0 = tpu.iota {dimensions = array<i32: 0>} : vector<16x1xi32>
    %c0_i32 = arith.constant 0 : i32
    %1 = vector.broadcast %c0_i32 : i32 to vector<16x1xi32>
    %2 = arith.cmpi eq, %0, %1 : vector<16x1xi32>
    %c15_i32 = arith.constant 15 : i32
    %3 = vector.broadcast %c15_i32 : i32 to vector<16x1xi32>
    %4 = arith.cmpi eq, %0, %3 : vector<16x1xi32>
    %c0 = arith.constant 0 : index
    %c0_0 = arith.constant 0 : index
    %c0_1 = arith.constant 0 : index
    %5 = vector.load %arg1[%c0, %c0_0, %c0_1] : memref<1x16x128xbf16, #tpu.memory_space<vmem>>, vector<1x16x128xbf16>
    %6 = vector.shape_cast %5 : vector<1x16x128xbf16> to vector<16x128xbf16>
    %7 = arith.extf %6 : vector<16x128xbf16> to vector<16x128xf32>
    %c1_i32 = arith.constant 1 : i32
    %8 = tpu.dynamic_rotate %7 by %c1_i32 dim 0 : vector<16x128xf32>, i32 -> vector<16x128xf32>
    %cst = arith.constant 0.000000e+00 : f32
    %9 = vector.shape_cast %2 : vector<16x1xi1> to vector<16x1xi1>
    %10 = vector.broadcast %9 : vector<16x1xi1> to vector<16x128xi1>
    %11 = vector.broadcast %cst : f32 to vector<16x128xf32>
    %12 = arith.select %10, %11, %8 : vector<16x128xi1>, vector<16x128xf32>
    %c15_i32_2 = arith.constant 15 : i32
    %13 = tpu.dynamic_rotate %7 by %c15_i32_2 dim 0 : vector<16x128xf32>, i32 -> vector<16x128xf32>
    %cst_3 = arith.constant 0.000000e+00 : f32
    %14 = vector.shape_cast %4 : vector<16x1xi1> to vector<16x1xi1>
    %15 = vector.broadcast %14 : vector<16x1xi1> to vector<16x128xi1>
    %16 = vector.broadcast %cst_3 : f32 to vector<16x128xf32>
    %17 = arith.select %15, %16, %13 : vector<16x128xi1>, vector<16x128xf32>
    %18 = tpu.concatenate %12, %7, %17 in 1 : vector<16x128xf32>, vector<16x128xf32>, vector<16x128xf32> -> vector<16x384xf32>
    %19 = arith.truncf %18 : vector<16x384xf32> to vector<16x384xbf16>
    %c0_4 = arith.constant 0 : index
    %c0_5 = arith.constant 0 : index
    %20 = vector.load %arg2[%c0_4, %c0_5] : memref<384x128xbf16, #tpu.memory_space<vmem>>, vector<384x128xbf16>
    %cst_6 = arith.constant dense<0.000000e+00> : vector<16x128xf32>
    %21 = tpu.matmul %19, %20, %cst_6 {dimension_numbers = #tpu.dot_dimension_numbers<[1], [0], [0], [1], [0, 0, 1, 1], [], []>} : vector<16x384xbf16>, vector<384x128xbf16>, vector<16x128xf32> -> vector<16x128xf32>
    %c0_7 = arith.constant 0 : index
    %c0_8 = arith.constant 0 : index
    %22 = vector.load %arg3[%c0_7, %c0_8] : memref<1x128xf32, #tpu.memory_space<vmem>>, vector<1x128xf32>
    %23 = vector.broadcast %22 : vector<1x128xf32> to vector<16x128xf32>
    %24 = arith.mulf %21, %23 : vector<16x128xf32>
    %c0_9 = arith.constant 0 : index
    %c0_10 = arith.constant 0 : index
    %25 = vector.load %arg4[%c0_9, %c0_10] : memref<1x128xf32, #tpu.memory_space<vmem>>, vector<1x128xf32>
    %26 = vector.broadcast %25 : vector<1x128xf32> to vector<16x128xf32>
    %27 = arith.addf %24, %26 : vector<16x128xf32>
    %cst_11 = arith.constant 0.000000e+00 : f32
    %28 = vector.broadcast %cst_11 : f32 to vector<16x128xf32>
    %29 = arith.maximumf %27, %28 : vector<16x128xf32>
    %c1_i32_12 = arith.constant 1 : i32
    %30 = tpu.dynamic_rotate %29 by %c1_i32_12 dim 0 : vector<16x128xf32>, i32 -> vector<16x128xf32>
    %cst_13 = arith.constant 0.000000e+00 : f32
    %31 = vector.shape_cast %2 : vector<16x1xi1> to vector<16x1xi1>
    %32 = vector.broadcast %31 : vector<16x1xi1> to vector<16x128xi1>
    %33 = vector.broadcast %cst_13 : f32 to vector<16x128xf32>
    %34 = arith.select %32, %33, %30 : vector<16x128xi1>, vector<16x128xf32>
    %c15_i32_14 = arith.constant 15 : i32
    %35 = tpu.dynamic_rotate %29 by %c15_i32_14 dim 0 : vector<16x128xf32>, i32 -> vector<16x128xf32>
    %cst_15 = arith.constant 0.000000e+00 : f32
    %36 = vector.shape_cast %4 : vector<16x1xi1> to vector<16x1xi1>
    %37 = vector.broadcast %36 : vector<16x1xi1> to vector<16x128xi1>
    %38 = vector.broadcast %cst_15 : f32 to vector<16x128xf32>
    %39 = arith.select %37, %38, %35 : vector<16x128xi1>, vector<16x128xf32>
    %40 = tpu.concatenate %34, %29, %39 in 1 : vector<16x128xf32>, vector<16x128xf32>, vector<16x128xf32> -> vector<16x384xf32>
    %41 = arith.truncf %40 : vector<16x384xf32> to vector<16x384xbf16>
    %c0_16 = arith.constant 0 : index
    %c0_17 = arith.constant 0 : index
    %42 = vector.load %arg5[%c0_16, %c0_17] : memref<384x128xbf16, #tpu.memory_space<vmem>>, vector<384x128xbf16>
    %cst_18 = arith.constant dense<0.000000e+00> : vector<16x128xf32>
    %43 = tpu.matmul %41, %42, %cst_18 {dimension_numbers = #tpu.dot_dimension_numbers<[1], [0], [0], [1], [0, 0, 1, 1], [], []>} : vector<16x384xbf16>, vector<384x128xbf16>, vector<16x128xf32> -> vector<16x128xf32>
    %c0_19 = arith.constant 0 : index
    %c0_20 = arith.constant 0 : index
    %44 = vector.load %arg6[%c0_19, %c0_20] : memref<1x128xf32, #tpu.memory_space<vmem>>, vector<1x128xf32>
    %45 = vector.broadcast %44 : vector<1x128xf32> to vector<16x128xf32>
    %46 = arith.mulf %43, %45 : vector<16x128xf32>
    %c0_21 = arith.constant 0 : index
    %c0_22 = arith.constant 0 : index
    %47 = vector.load %arg7[%c0_21, %c0_22] : memref<1x128xf32, #tpu.memory_space<vmem>>, vector<1x128xf32>
    %48 = vector.broadcast %47 : vector<1x128xf32> to vector<16x128xf32>
    %49 = arith.addf %46, %48 : vector<16x128xf32>
    %50 = arith.addf %49, %7 : vector<16x128xf32>
    %cst_23 = arith.constant 0.000000e+00 : f32
    %51 = vector.broadcast %cst_23 : f32 to vector<16x128xf32>
    %52 = arith.maximumf %50, %51 : vector<16x128xf32>
    %53 = vector.shape_cast %52 : vector<16x128xf32> to vector<1x16x128xf32>
    %c0_24 = arith.constant 0 : index
    %c0_25 = arith.constant 0 : index
    %c0_26 = arith.constant 0 : index
    %54 = vector.load %arg8[%c0_24, %c0_25, %c0_26] : memref<1x16x128xf32, #tpu.memory_space<vmem>>, vector<1x16x128xf32>
    tpu.vector_store %arg8[%c0_24, %c0_25, %c0_26], %53 {strides = array<i32>} : memref<1x16x128xf32, #tpu.memory_space<vmem>>, vector<1x16x128xf32>,
    return
  }
  func.func @transform_0(%arg0: i32) -> (i32, i32, i32) {
    %c0_i32 = arith.constant 0 : i32
    %c0_i32_0 = arith.constant 0 : i32
    %c0_i32_1 = arith.constant 0 : i32
    return %arg0, %c0_i32, %c0_i32_0 : i32, i32, i32
  }
  func.func @transform_1(%arg0: i32) -> (i32, i32) {
    %c0_i32 = arith.constant 0 : i32
    %c0_i32_0 = arith.constant 0 : i32
    %c0_i32_1 = arith.constant 0 : i32
    return %c0_i32, %c0_i32_0 : i32, i32
  }
  func.func @transform_2(%arg0: i32) -> (i32, i32) {
    %c0_i32 = arith.constant 0 : i32
    %c0_i32_0 = arith.constant 0 : i32
    %c0_i32_1 = arith.constant 0 : i32
    return %c0_i32, %c0_i32_0 : i32, i32
  }
  func.func @transform_3(%arg0: i32) -> (i32, i32) {
    %c0_i32 = arith.constant 0 : i32
    %c0_i32_0 = arith.constant 0 : i32
    %c0_i32_1 = arith.constant 0 : i32
    return %c0_i32, %c0_i32_0 : i32, i32
  }
  func.func @transform_4(%arg0: i32) -> (i32, i32) {
    %c0_i32 = arith.constant 0 : i32
    %c0_i32_0 = arith.constant 0 : i32
    %c0_i32_1 = arith.constant 0 : i32
    return %c0_i32, %c0_i32_0 : i32, i32
  }
  func.func @transform_5(%arg0: i32) -> (i32, i32) {
    %c0_i32 = arith.constant 0 : i32
    %c0_i32_0 = arith.constant 0 : i32
    %c0_i32_1 = arith.constant 0 : i32
    return %c0_i32, %c0_i32_0 : i32, i32
  }
  func.func @transform_6(%arg0: i32) -> (i32, i32) {
    %c0_i32 = arith.constant 0 : i32
    %c0_i32_0 = arith.constant 0 : i32
    %c0_i32_1 = arith.constant 0 : i32
    return %c0_i32, %c0_i32_0 : i32, i32
  }
  func.func @transform_7(%arg0: i32) -> (i32, i32, i32) {
    %c0_i32 = arith.constant 0 : i32
    %c0_i32_0 = arith.constant 0 : i32
    %c0_i32_1 = arith.constant 0 : i32
    return %arg0, %c0_i32, %c0_i32_0 : i32, i32, i32
  }
}

</mosaic_0001>

<bundles_post_ra>
// kernel: tpu_custom_call.1
= control target key start
LH: loop header
LB: loop body
LE: loop exit
PB: predicated region body
PF: predicated region fallthrough
CT: control target
= control target key end

     0   :  { %12 = vsyncpa [#allocation3], 0  ;;  %s1932_s0 = inlined_call_operand.hbm [shape: bf16[2,16,128], index: 0, kind: input, shape index: {}]   ;;  %s1933_s1 = inlined_call_operand.hbm [shape: bf16[384,128], index: 1, kind: input, shape index: {}]   ;;  %s1934_s2 = inlined_call_operand.vmem [shape: f32[1,128], index: 2, kind: input, shape index: {}]   ;;  %s1935_s3 = inlined_call_operand.vmem [shape: f32[1,128], index: 3, kind: input, shape index: {}]   ;;  %s1936_s4 = inlined_call_operand.hbm [shape: bf16[384,128], index: 4, kind: input, shape index: {}]   ;;  %s1937_s5 = inlined_call_operand.vmem [shape: f32[1,128], index: 5, kind: input, shape index: {}]   ;;  %s1938_s6 = inlined_call_operand.vmem [shape: f32[1,128], index: 6, kind: input, shape index: {}]   ;;  %s1939_s7 = inlined_call_operand.hbm [shape: f32[2,16,128], index: 7, kind: output, shape index: {}]  }
   0x1   :  { %14 = vsyncpa [#allocation3 + $0x1], 0 }
   0x2   :  { %15 = vsyncpa [#allocation6], 0 }
   0x3   :  { %16 = vsyncpa [#allocation4], 0 }
   0x4   :  { %18 = vsyncpa [#allocation4 + $0x1], 0  ;;  %s1602_s24 = smov 0   ;;  %s1604_s25 = smov 0  }
   0x5   :  { %s1606_s26 = smov 0   ;;  %s1608_s27 = smov 0  }
   0x6 LB: > { %s1623_s28 = sadd.s32 4294967295, %s1549_s27   ;;  %s1076_s29 = sadd.s32 4294967294, %s1549_s27   ;;  %s1549_s27 = sphi %s1608_s27, %s1965_s27   ;;  %s1545_s26 = sphi %s1606_s26, %s1964_s26   ;;  %s1541_s25 = sphi %s1604_s25, %s1963_s25   ;;  %s1537_s24 = sphi %s1602_s24, %s1962_s24  }
   0x7   : > { %p44_p0 = scmp.ne.s32.totalorder %s1541_s25, %s1537_s24  ;;  %p1940_p1 = scmp.eq.s32.totalorder %s1623_s28, 0 }
   0x8   : > { %p200_p3 = scmp.eq.s32.totalorder %s1076_s29, 1  ;;  %p1077_p5 = scmp.ge.s32.totalorder %s1549_s27, 1 }
   0x9   : > { %p1632_p4 = por %p1940_p1, %p44_p0  ;;  %p207_p7 = scmp.lt.s32.totalorder %s1549_s27, 3 }
   0xa   : > { %p1637_p6 = por %p200_p3, %p44_p0  ;;  %s1551_s10 = smov [#allocation5]  }
   0xb   : > { %s1944_s30 = scalar_select %p1632_p4, 1, 0 }
   0xc   : > { %s1945_s8 = scalar_select %p1637_p6, 1, 0 }
   0xd   : > { %p1642_p8 = pnand %p1077_p5, %p207_p7  ;;  %s219_s11 = sshll.u32 %s1551_s10, 4  ;;  %s1646_s11 = int_to_ptr.vmem [resolvable:$true] %s219_s11 }
   0xe   : > { %s1552_s13 = smov [#allocation7]   ;;  %s1393_s17 = scalar_lea.hbm %s1933_s1, 3072 }
   0xf   : > { %p1281_p9 = pneg %p1642_p8  ;;  %s238_s14 = sshll.u32 %s1552_s13, 4  ;;  %s1657_s14 = int_to_ptr.vmem [resolvable:$true] %s238_s14 }
  0x10   : > { %p1394_p12 = scmp.ne.s32.totalorder %s1933_s1, %s1393_s17  ;;  %p1400_p5 = scmp.lt.u32.totalorder %s1393_s17, %s1933_s1 }
  0x11   : > { %p1653_p11 = pnand %p1281_p9, %p1940_p1 }
  0x13   : > { %p1395_p13 = pneg %p1653_p11 }
  0x15   : > { %p1396_p0 = pnand %p1395_p13, %p1394_p12 }
  0x17   : > { %p1397_p3 = pneg %p1396_p0 }
  0x19   : > { %p1402_p7 = pnand %p1400_p5, %p1397_p3 }
  0x1b   : > { %1405 = shalt.err (!%p1402_p7)
}
  0x1c   : > { %s1406_s22 = scalar_lea.vmem %s1646_s11, 3072  ;;  %p1414_p2 = scmp.lt.s32.totalorder %s1646_s11, %s1646_s11 }
  0x1d   : > { %p1407_p9 = scmp.ne.s32.totalorder %s1646_s11, %s1406_s22  ;;  %p1415_p12 = scmp.lt.s32.totalorder %s1406_s22, %s1406_s22 }
  0x1f   : > { %p1409_p10 = pnand %p1407_p9, %p1395_p13  ;;  %p1416_p0 = por %p1415_p12, %p1414_p2 }
  0x21   : > { %p1410_p1 = pneg %p1409_p10 }
  0x23   : > { %p1417_p6 = pnand %p1416_p0, %p1410_p1 }
  0x25   : > { %1420 = shalt.err (!%p1417_p6)
}
  0x26   : > { %s1941_s23 = smov 64   ;;  %s1554_s29 = smov 4  }
  0x27   : > { %1284 = dma.hbm_to_vmem [thread:$0]  (!%p1653_p11), %s1933_s1, 3072, %s1646_s11, [#allocation6], %s1941_s23, %s1941_s23, %s1554_s29  }
  0x28   : > { %s1421_s17 = scalar_lea.hbm %s1936_s4, 3072 }
  0x29   : > { %p1422_p1 = scmp.ne.s32.totalorder %s1936_s4, %s1421_s17  ;;  %p1428_p10 = scmp.lt.u32.totalorder %s1421_s17, %s1936_s4 }
  0x2b   : > { %p1424_p2 = pnand %p1422_p1, %p1395_p13 }
  0x2d   : > { %p1425_p6 = pneg %p1424_p2 }
  0x2f   : > { %p1430_p3 = pnand %p1428_p10, %p1425_p6 }
  0x31   : > { %1433 = shalt.err (!%p1430_p3)
}
  0x32   : > { %s1434_s11 = scalar_lea.vmem %s1657_s14, 3072  ;;  %p1442_p12 = scmp.lt.s32.totalorder %s1657_s14, %s1657_s14 }
  0x33   : > { %p1435_p5 = scmp.ne.s32.totalorder %s1657_s14, %s1434_s11  ;;  %p1443_p0 = scmp.lt.s32.totalorder %s1434_s11, %s1434_s11 }
  0x35   : > { %p1437_p7 = pnand %p1435_p5, %p1395_p13  ;;  %p1444_p1 = por %p1443_p0, %p1442_p12 }
  0x37   : > { %p1438_p9 = pneg %p1437_p7 }
  0x39   : > { %p1445_p2 = pnand %p1444_p1, %p1438_p9 }
  0x3b   : > { %1448 = shalt.err (!%p1445_p2)
}
  0x3c   : > { %1287 = dma.hbm_to_vmem [thread:$0]  (!%p1653_p11), %s1936_s4, 3072, %s1657_s14, [#allocation6], %s1941_s23, %s1941_s23, %s1554_s29  }
  0x3d   : > { %s1718_s12 = sadd.s32 1, %s1549_s27   ;;  %s31_s13 = sadd.s32 1, %s1545_s26 }
  0x3e   : > { %s28_s15 = ssub.s32 %s1549_s27, %s1718_s12  ;;  %p38_p13 = scmp.ne.s32.totalorder %s1545_s26, %s1541_s25 }
  0x3f   : > { %p29_p6 = scmp.eq.s32.totalorder %s28_s15, 0  ;;  %p39_p10 = scmp.eq.s32.totalorder %s1549_s27, 0 }
  0x40   : > { %p1948_p3 = scmp.eq.s32.totalorder %s1623_s28, 1  ;;  %p1298_p7 = scmp.lt.s32.totalorder %s1549_s27, 2 }
  0x41   : > { %s1734_s17 = scalar_select %p29_p6, %s1545_s26, %s31_s13  }
  0x42   : > { %p1728_p5 = por %p1948_p3, %p38_p13  ;;  %p40_p9 = por %p39_p10, %p38_p13 }
  0x43   : > { %s258_s18 = sand.u32 1, %s1545_s26   ;;  %s1163_s14 = sshll.u32 %s1549_s27, 7 }
  0x44   : > { %s1949_s16 = scalar_select %p1728_p5, 1, 0 }
  0x45   : > { %s1081_s19 = sshll.u32 %s258_s18, 3  ;;  %s1741_s11 = scalar_lea.hbm %s1932_s0, %s1163_s14 }
  0x46   : > { %s262_s22 = scalar_lea.vmem [#allocation2], %s1081_s19  ;;  %p1745_p11 = pnand %p1298_p7, %p40_p9 }
  0x47   : > { %s269_s10 = sshll.u32 %s262_s22, 4  ;;  %s1749_s15 = scalar_lea.sflag [#allocation3], %s258_s18  ;;  %s1743_s10 = int_to_ptr.vmem [resolvable:$true] %s269_s10 }
  0x48   : > { %s1449_s23 = scalar_lea.hbm %s1741_s11, 128  ;;  %p1451_p0 = pneg %p1745_p11 }
  0x49   : > { %p1450_p12 = scmp.ne.s32.totalorder %s1741_s11, %s1449_s23  ;;  %s1454_s20 = scalar_lea.hbm %s1932_s0, 256 }
  0x4a   : > { %p1455_p13 = scmp.lt.u32.totalorder %s1741_s11, %s1932_s0  ;;  %p1456_p6 = scmp.lt.u32.totalorder %s1454_s20, %s1449_s23 }
  0x4b   : > { %p1452_p1 = pnand %p1451_p0, %p1450_p12  ;;  %p1458_p3 = scmp.lt.u32.totalorder %s1449_s23, %s1741_s11 }
  0x4c   : > { %p1457_p10 = por %p1456_p6, %p1455_p13 }
  0x4d   : > { %p1453_p2 = pneg %p1452_p1 }
  0x4e   : > { %p1459_p7 = por %p1458_p3, %p1457_p10 }
  0x50   : > { %p1460_p9 = pnand %p1459_p7, %p1453_p2 }
  0x52   : > { %1463 = shalt.err (!%p1460_p9)
}
  0x53   : > { %s1464_s18 = scalar_lea.vmem %s1743_s10, 128  ;;  %s1555_s19 = smov [#allocation2]  }
  0x54   : > { %p1465_p12 = scmp.ne.s32.totalorder %s1743_s10, %s1464_s18  ;;  %s1469_s14 = sshll.u32 %s1555_s19, 4  ;;  %s1470_s14 = int_to_ptr.vmem [resolvable:$false] %s1469_s14 }
  0x55   : > { %s1471_s21 = scalar_lea.vmem %s1470_s14, 256  ;;  %p1472_p4 = scmp.lt.s32.totalorder %s1743_s10, %s1470_s14 }
  0x56   : > { %p1467_p1 = pnand %p1465_p12, %p1451_p0  ;;  %p1473_p13 = scmp.lt.s32.totalorder %s1471_s21, %s1464_s18 }
  0x58   : > { %p1468_p5 = pneg %p1467_p1  ;;  %p1474_p6 = por %p1473_p13, %p1472_p4 }
  0x5a   : > { %p1475_p10 = pnand %p1474_p6, %p1468_p5 }
  0x5c   : > { %1478 = shalt.err (!%p1475_p10)
}
  0x5d   : > { %s1951_s23 = smov 64   ;;  %281 = sbr.rel (%p1642_p8) target bundleno = 610 (0x262), region = 48 }
  0x5e   : > { %1291 = dma.hbm_to_vmem [thread:$0]  (!%p1745_p11), %s1741_s11, 128, %s1743_s10, %s1749_s15, %s1951_s23, %s1951_s23, %s1554_s29  }
  0x5f   : > { %s1783_s20 = sand.u32 (!%p1642_p8), 1, %s1541_s25   ;;  %p1952_p4 = scmp.ne.s32.totalorder (!%p1642_p8), %s1944_s30, 0 }
  0x60   : > { %s1085_s22 = sshll.u32 (!%p1642_p8), %s1783_s20, 3  ;;  %s284_s18 = scalar_lea.sflag (!%p1642_p8), [#allocation3], %s1783_s20 }
  0x61   : > { %s1787_s19 = scalar_lea.vmem (!%p1642_p8), [#allocation2], %s1085_s22 }
  0x64   : > { %1524 = dma.done.wait (%p1952_p4), %s284_s18, 128  }
  0x65   : > { %1526 = vsyncadd (%p1952_p4), %s284_s18, 4294967168  ;;  %p1953_p5 = scmp.eq.s32.totalorder %s1623_s28, 0 }
  0x67   : > { %1528 = dma.done.wait (%p1953_p5), [#allocation6], 6144   ;;  %p1954_p8 = pmov %p1953_p5 }
  0x68   : > { %v1556_v0 = vmov 0.0   ;;  %vm1557_vm0 = vmmov 0   ;;  %v1343_v1 = vld [vmem:[#allocation5 + $0x40] sm:$0xff]   ;;  %v1346_v4 = vld [vmem:[#allocation5 + $0x48] sm:$0xff]   ;;  %v1349_v7 = vld [vmem:[#allocation5 + $0x50] sm:$0xff]   ;;  %v327_v15 = vlaneseq  ;;  %vm1558_vm5 = vmmov 1  }
  0x69   : > { %1530 = vsyncadd (%p1954_p8), [#allocation6], 4294961152  ;;  %1229 = vmatprep.subr.bf16.mxu1 %v1556_v0  ;;  %1245 = vmatprep.mubr.msk.bf16.mxu1 %vm1557_vm0, %v1556_v0  ;;  %v1344_v2 = vld [vmem:[#allocation5] sm:$0xff]   ;;  %v1347_v5 = vld [vmem:[#allocation5 + $0x8] sm:$0xff]   ;;  %s1088_s15 = sshll.u32 %s1783_s20, 4  ;;  %s1164_s23 = sshll.u32 %s1623_s28, 8 }
  0x6a   : > { %1167 = vmatprep.subr.bf16.mxu0 %v1343_v1  ;;  %v1345_v3 = vld [vmem:[#allocation5 + $0x80] sm:$0xff]   ;;  %v1348_v6 = vld [vmem:[#allocation5 + $0x88] sm:$0xff]   ;;  %v1350_v8 = vld [vmem:[#allocation5 + $0x10] sm:$0xff]   ;;  %v1804_v19 = vshrl.u32 %v327_v15, 7  ;;  %s325_s22 = scalar_lea.vmem [#allocation8], %s1088_s15  ;;  %s1886_s9 = scalar_lea.hbm %s1939_s7, %s1164_s23 }
  0x6b   : > { %1168 = vmatpush3.bf16.msra.mxu0 %v1344_v2  ;;  %1230 = vmatpush3.bf16.msra.mxu1 %v1345_v3  ;;  %v1351_v9 = vld [vmem:[#allocation5 + $0x90] sm:$0xff]   ;;  %v1352_v10 = vld [vmem:[#allocation5 + $0x58] sm:$0xff]   ;;  %v1355_v13 = vld [vmem:[#allocation5 + $0x60] sm:$0xff]   ;;  %s984_s18 = sshll.u32 %s325_s22, 4  ;;  %s971_s29 = scalar_lea.sflag [#allocation4], %s1783_s20  ;;  %s1888_s18 = int_to_ptr.vmem [resolvable:$true] %s984_s18 }
  0x6c   : > { %1169 = vmatprep.subr.bf16.mxu0 %v1346_v4  ;;  %1231 = vmatprep.subr.bf16.mxu1 %v1556_v0  ;;  %v1353_v11 = vld [vmem:[#allocation5 + $0x18] sm:$0xff]   ;;  %v1356_v14 = vld [vmem:[#allocation5 + $0x20] sm:$0xff]   ;;  %v1358_v17 = vld [vmem:[#allocation5 + $0x68] sm:$0xff]   ;;  %v329_v23 = vadd.s32 8, %v1804_v19  ;;  %vm340_vm1 = vcmp.lt.s32.totalorder %v1804_v19, 1  ;;  %vm1165_vm2 = vcmp.ne.s32.totalorder %v1804_v19, 0 }
  0x6d   : > { %v1354_v12 = vld [vmem:[#allocation5 + $0x98] sm:$0xff]   ;;  %v1357_v16 = vld [vmem:[#allocation5 + $0xa0] sm:$0xff]   ;;  %v1359_v18 = vld [vmem:[#allocation5 + $0x28] sm:$0xff]   ;;  %vm351_vm3 = vcmp.lt.s32.totalorder %v1804_v19, 7  ;;  %s1479_s28 = scalar_lea.vmem %s1888_s18, 256  ;;  %p1959_p0 = scmp.ne.s32.totalorder %s1949_s16, 0 }
  0x6e   : > { %v1360_v20 = vld [vmem:[#allocation5 + $0xa8] sm:$0xff]   ;;  %v1361_v21 = vld [vmem:[#allocation5 + $0x70] sm:$0xff]   ;;  %v1364_v25 = vld [vmem:[#allocation5 + $0x78] sm:$0xff]   ;;  %vm1166_vm4 = vcmp.ne.s32.totalorder %v329_v23, 15  ;;  %p1480_p11 = scmp.ne.s32.totalorder %s1888_s18, %s1479_s28  ;;  %s1559_s11 = smov [#allocation8]  }
  0x6f   : > { %1170 = vmatpush3.bf16.msra.mxu0 %v1347_v5  ;;  %1232 = vmatpush3.bf16.msra.mxu1 %v1348_v6  ;;  %v1362_v22 = vld [vmem:[#allocation5 + $0x30] sm:$0xff]   ;;  %v1365_v27 = vld [vmem:[#allocation5 + $0x38] sm:$0xff]   ;;  %vm1823_vm6 = vmpackc.low %vm1558_vm5, %vm1165_vm2  ;;  %s1483_s10 = sshll.u32 %s1559_s11, 4  ;;  %s1484_s10 = int_to_ptr.vmem [resolvable:$false] %s1483_s10 }
  0x70   : > { %1171 = vmatprep.subr.bf16.mxu0 %v1349_v7  ;;  %1233 = vmatprep.subr.bf16.mxu1 %v1556_v0  ;;  %v1363_v24 = vld [vmem:[#allocation5 + $0xb0] sm:$0xff]   ;;  %v1366_v30 = vld [vmem:[#allocation5 + $0xb8] sm:$0xff]   ;;  %v1368_v36 = vld [vmem:[#allocation7 + $0x40] sm:$0xff]   ;;  %p1481_p2 = pnand %p1480_p11, %p1959_p0  ;;  %s1485_s13 = scalar_lea.vmem %s1484_s10, 512 }
  0x71   : > { %v334_v26 = vld [vmem:[%s1787_s19] sm:$0xff]   ;;  %vm1837_vm7 = vmpackc.low %vm1166_vm4, %vm1558_vm5  ;;  %v1369_v43 = vld [vmem:[#allocation7] sm:$0xff]   ;;  %p1486_p7 = scmp.lt.s32.totalorder %s1888_s18, %s1484_s10  ;;  %p1487_p9 = scmp.lt.s32.totalorder %s1485_s13, %s1479_s28 }
  0x72   : > { %v1812_v28 = vunpack.c.l.bf16 %v334_v26  ;;  %v1814_v29 = vunpack.c.h.bf16 %v334_v26  ;;  %587 = vmatprep.mubr.bf16.mxu0 %v334_v26  ;;  %v1370_v45 = vld [vmem:[#allocation7 + $0x80] sm:$0xff]   ;;  %v1371_v46 = vld [vmem:[#allocation7 + $0x48] sm:$0xff]   ;;  %v1374_v49 = vld [vmem:[#allocation7 + $0x50] sm:$0xff]   ;;  %p1482_p3 = pneg %p1481_p2 }
  0x73   : > { %1172 = vmatpush3.bf16.msra.mxu0 %v1350_v8  ;;  %1234 = vmatpush3.bf16.msra.mxu1 %v1351_v9  ;;  %v1372_v47 = vld [vmem:[#allocation7 + $0x8] sm:$0xff]   ;;  %v1375_v50 = vld [vmem:[#allocation7 + $0x10] sm:$0xff]   ;;  %v1377_v52 = vld [vmem:[#allocation7 + $0x58] sm:$0xff]   ;;  %p1488_p12 = por %p1487_p9, %p1486_p7 }
  0x74   : > { %1173 = vmatprep.subr.bf16.mxu0 %v1352_v10  ;;  %1235 = vmatprep.subr.bf16.mxu1 %v1556_v0  ;;  %v338_v31 = vrot.slane %v1812_v28, 7  ;;  %v339_v32 = vrot.slane %v1814_v29, 7  ;;  %v349_v33 = vrot.slane %v1812_v28, 1  ;;  %v350_v34 = vrot.slane %v1814_v29, 1  ;;  %v1373_v48 = vld [vmem:[#allocation7 + $0x88] sm:$0xff]   ;;  %v1376_v51 = vld [vmem:[#allocation7 + $0x90] sm:$0xff]  }
  0x75   : > { %v1378_v53 = vld [vmem:[#allocation7 + $0x18] sm:$0xff]   ;;  %v1380_v55 = vld [vmem:[#allocation7 + $0x60] sm:$0xff]   ;;  %v1383_v58 = vld [vmem:[#allocation7 + $0x68] sm:$0xff]   ;;  %p1489_p1 = pnand %p1488_p12, %p1482_p3 }
  0x76   : > { %v341_v37 = vsel %vm340_vm1, %v338_v31, %v339_v32  ;;  %v342_v38 = vsel %vm340_vm1, %v339_v32, %v338_v31  ;;  %v352_v39 = vsel %vm351_vm3, %v349_v33, %v350_v34  ;;  %v353_v40 = vsel %vm351_vm3, %v350_v34, %v349_v33  ;;  %v1379_v54 = vld [vmem:[#allocation7 + $0x98] sm:$0xff]   ;;  %v1381_v56 = vld [vmem:[#allocation7 + $0x20] sm:$0xff]   ;;  %v1384_v59 = vld [vmem:[#allocation7 + $0x28] sm:$0xff]  }
  0x77   : > { %1174 = vmatpush3.bf16.msra.mxu0 %v1353_v11  ;;  %1236 = vmatpush3.bf16.msra.mxu1 %v1354_v12  ;;  %v1116_v42 = vpack.c.bf16 %v341_v37, %v342_v38  ;;  %v1120_v44 = vpack.c.bf16 %v353_v40, %v352_v39  ;;  %v1382_v57 = vld [vmem:[#allocation7 + $0xa0] sm:$0xff]   ;;  %v1385_v60 = vld [vmem:[#allocation7 + $0xa8] sm:$0xff]   ;;  %v1386_v61 = vld [vmem:[#allocation7 + $0x70] sm:$0xff]  }
  0x78   : > { %1175 = vmatprep.subr.bf16.mxu0 %v1355_v13  ;;  %1237 = vmatprep.subr.bf16.mxu1 %v1556_v0  ;;  %v1387_v62 = vld [vmem:[#allocation7 + $0x30] sm:$0xff]   ;;  %v1389_v1 = vld [vmem:[#allocation7 + $0x78] sm:$0xff]  }
  0x79   : > { %v1388_v63 = vld [vmem:[#allocation7 + $0xb0] sm:$0xff]   ;;  %v1390_v2 = vld [vmem:[#allocation7 + $0x38] sm:$0xff]  }
  0x7a   : > { %v1391_v3 = vld [vmem:[#allocation7 + $0xb8] sm:$0xff]   ;;  %v1122_v10 = vld [vmem:[%s1934_s2] ss:$0 sm:$0xff] }
  0x7b   : > { %1176 = vmatpush3.bf16.msra.mxu0 %v1356_v14  ;;  %1238 = vmatpush3.bf16.msra.mxu1 %v1357_v16  ;;  %v1123_v15 = vld [vmem:[%s1935_s3] ss:$0 sm:$0xff] }
  0x7c   : > { %1177 = vmatprep.subr.bf16.mxu0 %v1358_v17  ;;  %1239 = vmatprep.subr.bf16.mxu1 %v1556_v0  ;;  %v1156_v19 = vld [vmem:[%s1937_s5] ss:$0 sm:$0xff] }
  0x7d   : > { %v1157_v41 = vld [vmem:[%s1938_s6] ss:$0 sm:$0xff] }
  0x7f   : > { %1178 = vmatpush3.bf16.msra.mxu0 %v1359_v18  ;;  %1240 = vmatpush3.bf16.msra.mxu1 %v1360_v20 }
  0x80   : > { %1179 = vmatprep.subr.bf16.mxu0 %v1361_v21  ;;  %1241 = vmatprep.subr.bf16.mxu1 %v1556_v0 }
  0x83   : > { %1180 = vmatpush3.bf16.msra.mxu0 %v1362_v22  ;;  %1242 = vmatpush3.bf16.msra.mxu1 %v1363_v24 }
  0x84   : > { %1181 = vmatprep.subr.bf16.mxu0 %v1364_v25  ;;  %1243 = vmatprep.subr.bf16.mxu1 %v1556_v0 }
  0x87   : > { %1182 = vmatpush3.bf16.msra.mxu0 %v1365_v27  ;;  %1244 = vmatpush3.bf16.msra.mxu1 %v1366_v30 }
  0x88   : > { %1198 = vmatprep.subr.bf16.mxu0 %v1368_v36  ;;  %1249 = vmatprep.subr.bf16.mxu1 %v1556_v0 }
  0x8a   : > { %1117 = vmatmul.mubr.msk.bf16.vlgmr.msra.gmra.mrb[0].mxu0 %vm1823_vm6, %v1116_v42  ;;  %1246 = vmatmul.mubr.msk.bf16.vlgmr.msra.gmra.mrb[0].mxu1 %vm1837_vm7, %v1120_v44 }
  0x8b   : > { %1199 = vmatpush3.bf16.msra.mxu0 %v1369_v43  ;;  %1250 = vmatpush3.bf16.msra.mxu1 %v1370_v45 }
  0x8c   : > { %1200 = vmatprep.subr.bf16.mxu0 %v1371_v46  ;;  %1251 = vmatprep.subr.bf16.mxu1 %v1556_v0 }
  0x8d   : > { %1265 = vmatprep.mubr.msk.bf16.mxu1 %vm1557_vm0, %v1556_v0 }
  0x8f   : > { %1201 = vmatpush3.bf16.msra.mxu0 %v1372_v47  ;;  %1252 = vmatpush3.bf16.msra.mxu1 %v1373_v48 }
  0x90   : > { %1202 = vmatprep.subr.bf16.mxu0 %v1374_v49  ;;  %1253 = vmatprep.subr.bf16.mxu1 %v1556_v0 }
  0x93   : > { %1203 = vmatpush3.bf16.msra.mxu0 %v1375_v50  ;;  %1254 = vmatpush3.bf16.msra.mxu1 %v1376_v51 }
  0x94   : > { %1204 = vmatprep.subr.bf16.mxu0 %v1377_v52  ;;  %1255 = vmatprep.subr.bf16.mxu1 %v1556_v0 }
  0x97   : > { %1205 = vmatpush3.bf16.msra.mxu0 %v1378_v53  ;;  %1256 = vmatpush3.bf16.msra.mxu1 %v1379_v54 }
  0x98   : > { %1257 = vmatprep.subr.bf16.mxu1 %v1556_v0  ;;  %1206 = vmatprep.subr.bf16.mxu0 %v1380_v55 }
  0x9b   : > { %1207 = vmatpush3.bf16.msra.mxu0 %v1381_v56  ;;  %1258 = vmatpush3.bf16.msra.mxu1 %v1382_v57 }
  0x9c   : > { %1259 = vmatprep.subr.bf16.mxu1 %v1556_v0  ;;  %1208 = vmatprep.subr.bf16.mxu0 %v1383_v58 }
  0x9f   : > { %1209 = vmatpush3.bf16.msra.mxu0 %v1384_v59  ;;  %1260 = vmatpush3.bf16.msra.mxu1 %v1385_v60 }
  0xa0   : > { %1261 = vmatprep.subr.bf16.mxu1 %v1556_v0  ;;  %1210 = vmatprep.subr.bf16.mxu0 %v1386_v61 }
  0xa3   : > { %1211 = vmatpush3.bf16.msra.mxu0 %v1387_v62  ;;  %1262 = vmatpush3.bf16.msra.mxu1 %v1388_v63 }
  0xa4   : > { %1263 = vmatprep.subr.bf16.mxu1 %v1556_v0  ;;  %1212 = vmatprep.subr.bf16.mxu0 %v1389_v1 }
  0xa7   : > { %1213 = vmatpush3.bf16.msra.mxu0 %v1390_v2  ;;  %1264 = vmatpush3.bf16.msra.mxu1 %v1391_v3 }
 0x15d   : > { %v1183_v4 = vpop.f32.mrb[0].mxu0  ;;  %v630_v5 = vpop.f32.mrb[0].mxu1 }
 0x15e   : > { %v1184_v6 = vpop.f32.mrb[1].mxu0  ;;  %v1247_v8 = vpop.f32.mrb[1].mxu1 }
 0x15f   : > { %v1185_v7 = vadd.f32 %v1184_v6, %v1183_v4  ;;  %v1186_v9 = vpop.f32.mrb[2].mxu0  ;;  %v633_v11 = vpop.f32.mrb[2].mxu1 }
 0x160   : > { %v1187_v12 = vpop.f32.mrb[3].mxu0  ;;  %v1248_v0 = vpop.f32.mrb[3].mxu1 }
 0x161   : > { %v631_v13 = vadd.f32 %v1185_v7, %v630_v5  ;;  %v1188_v14 = vadd.f32 %v1187_v12, %v1186_v9 }
 0x163   : > { %v644_v16 = vmul.f32 %v1122_v10, %v631_v13  ;;  %v634_v17 = vadd.f32 %v1188_v14, %v633_v11 }
 0x165   : > { %v653_v18 = vadd.f32 %v1123_v15, %v644_v16  ;;  %v645_v20 = vmul.f32 %v1122_v10, %v634_v17 }
 0x167   : > { %v655_v21 = vmax.f32 %v653_v18, 0.0  ;;  %v654_v22 = vadd.f32 %v1123_v15, %v645_v20 }
 0x169   : > { %v656_v23 = vmax.f32 %v654_v22, 0.0  ;;  %v657_v24 = vrot.slane %v655_v21, 7  ;;  %v663_v25 = vrot.slane %v655_v21, 1 }
 0x16b   : > { %v658_v26 = vrot.slane %v656_v23, 7  ;;  %v664_v27 = vrot.slane %v656_v23, 1  ;;  %v670_v30 = vpack.c.bf16 %v656_v23, %v655_v21 }
 0x16d   : > { %896 = vmatprep.mubr.bf16.mxu0 %v670_v30  ;;  %v659_v31 = vsel %vm340_vm1, %v657_v24, %v658_v26  ;;  %v660_v32 = vsel %vm340_vm1, %v658_v26, %v657_v24  ;;  %v665_v33 = vsel %vm351_vm3, %v663_v25, %v664_v27  ;;  %v666_v34 = vsel %vm351_vm3, %v664_v27, %v663_v25 }
 0x16e   : > { %v1150_v36 = vpack.c.bf16 %v659_v31, %v660_v32  ;;  %v1154_v37 = vpack.c.bf16 %v666_v34, %v665_v33 }
 0x170   : > { %1151 = vmatmul.mubr.msk.bf16.vlgmr.msra.gmra.mrb[4].mxu0 %vm1823_vm6, %v1150_v36  ;;  %1266 = vmatmul.mubr.msk.bf16.vlgmr.msra.gmra.mrb[4].mxu1 %vm1837_vm7, %v1154_v37 }
 0x243   : > { %v1214_v38 = vpop.f32.mrb[4].mxu0  ;;  %v939_v39 = vpop.f32.mrb[4].mxu1 }
 0x244   : > { %v1215_v40 = vpop.f32.mrb[5].mxu0  ;;  %v1267_v42 = vpop.f32.mrb[5].mxu1 }
 0x245   : > { %v1216_v43 = vadd.f32 %v1215_v40, %v1214_v38  ;;  %v1217_v44 = vpop.f32.mrb[6].mxu0  ;;  %v942_v45 = vpop.f32.mrb[6].mxu1 }
 0x246   : > { %v1218_v46 = vpop.f32.mrb[7].mxu0  ;;  %v1268_v47 = vpop.f32.mrb[7].mxu1 }
 0x247   : > { %v940_v35 = vadd.f32 %v1216_v43, %v939_v39  ;;  %v1219_v48 = vadd.f32 %v1218_v46, %v1217_v44 }
 0x249   : > { %v953_v49 = vmul.f32 %v1156_v19, %v940_v35  ;;  %v943_v50 = vadd.f32 %v1219_v48, %v942_v45 }
 0x24b   : > { %v962_v51 = vadd.f32 %v1157_v41, %v953_v49  ;;  %v954_v52 = vmul.f32 %v1156_v19, %v943_v50 }
 0x24d   : > { %v964_v53 = vadd.f32 %v962_v51, %v1812_v28  ;;  %v963_v54 = vadd.f32 %v1157_v41, %v954_v52 }
 0x24f   : > { %v966_v55 = vmax.f32 %v964_v53, 0.0  ;;  %v965_v56 = vadd.f32 %v963_v54, %v1814_v29 }
 0x251   : > { %968 = vst [vmem:[%s325_s22] sm:$0xff] %v966_v55  ;;  %v967_v57 = vmax.f32 %v965_v56, 0.0 }
 0x253   : > { %969 = vst [vmem:[%s325_s22 + $0x8] sm:$0xff] %v967_v57 }
 0x254   : > { %1492 = shalt.err (!%p1489_p1)
}
 0x255   : > { %s1493_s15 = scalar_lea.hbm %s1886_s9, 256  ;;  %s1497_s23 = scalar_lea.hbm %s1939_s7, 512 }
 0x256   : > { %p1494_p13 = scmp.ne.s32.totalorder %s1886_s9, %s1493_s15  ;;  %p1498_p4 = scmp.lt.u32.totalorder %s1886_s9, %s1939_s7 }
 0x257   : > { %p1499_p5 = scmp.lt.u32.totalorder %s1497_s23, %s1493_s15  ;;  %p1501_p11 = scmp.lt.u32.totalorder %s1493_s15, %s1886_s9 }
 0x258   : > { %p1495_p6 = pnand %p1494_p13, %p1959_p0 }
 0x259   : > { %p1500_p8 = por %p1499_p5, %p1498_p4 }
 0x25a   : > { %p1496_p10 = pneg %p1495_p6 }
 0x25b   : > { %p1502_p2 = por %p1501_p11, %p1500_p8 }
 0x25d   : > { %p1503_p3 = pnand %p1502_p2, %p1496_p10 }
 0x25f   : > { %1506 = shalt.err (!%p1503_p3)
}
 0x260   : > { %s1560_s30 = smov 128   ;;  %s1561_s28 = smov 8  }
 0x261   : > { %1279 = dma.vmem_to_hbm [thread:$0]  (%p1959_p0), %s1888_s18, 256, %s1886_s9, %s971_s29, %s1560_s30, %s1560_s30, %s1561_s28  }
 0x262 PF: > { %s999_s11 = sand.u32 1, %s1537_s24   ;;  %p1960_p7 = scmp.ne.s32.totalorder %s1945_s8, 0 }
 0x263   : > { %p1961_p9 = scmp.ge.s32.totalorder %s1549_s27, 2  ;;  %s1000_s10 = scalar_lea.sflag [#allocation4], %s999_s11 }
 0x265   : > { %p1293_p12 = pnand %p1961_p9, %p1960_p7 }
 0x267   : > { %1532 = dma.done.wait (!%p1293_p12), %s1000_s10, 256  }
 0x268   : > { %1534 = vsyncadd (!%p1293_p12), %s1000_s10, 4294967040  ;;  %p21_p1 = scmp.ge.s32.totalorder %s1718_s12, 4   ;;  %s1962_s24 = smov %s1541_s25 }
 0x269   : > { %s1963_s25 = smov %s1545_s26  ;;  %s1964_s26 = smov %s1734_s17 }
 0x26a   : > { %s1965_s27 = smov %s1718_s12  ;;  %23 = sbr.rel (!%p21_p1) target bundleno = 6 (0x6), region = 101 }
 0x271   :  { %1005 = vsyncpa [#allocation3], 1 }
 0x272   :  { %1007 = vsyncpa [#allocation3 + $0x1], 1 }
 0x273   :  { %1008 = vsyncpa [#allocation6], 1 }
 0x274   :  { %1009 = vsyncpa [#allocation4], 1 }
 0x275   :  { %1011 = vsyncpa [#allocation4 + $0x1], 1 }

</bundles_post_ra>
